<compile_context>
chip_gen: v7x
topology: tpu7x:2x2x1
jax: 0.10.0
libtpu: 0.0.40
codegen_flags: <defaults>
</compile_context>

<pallas_src>
import numpy as np
import jax
import jax.numpy as jnp
from jax.experimental import pallas as pl
from jax.experimental.pallas import tpu as pltpu


def _compl_mul_kernel(x_ref, w_ref, o_ref):
    """Complex per-mode channel mixing for one (section, mode-tile) block.

    x_ref: (1, 2, B, Cin,  MT)   [axis 1 = (real, imag)]
    w_ref: (1, 2, Cin, Cout, MT)
    o_ref: (1, 2, B, Cout, MT)
    out[b, o, m] = sum_i x[b, i, m] * w[i, o, m]   (complex)
    """
    _, _, b, cin, mt = x_ref.shape
    cout = w_ref.shape[3]

    acc_r = jnp.zeros((b, cout, mt), jnp.float32)
    acc_i = jnp.zeros((b, cout, mt), jnp.float32)

    # Static unroll over Cin: per-iteration loads from VMEM, only the
    # (B, Cout, MT) accumulators stay live. 4 muls + adds per complex MAC.
    for i in range(cin):
        xr_i = x_ref[0, 0, :, i, :][:, None, :]   # (B, 1, MT)
        xi_i = x_ref[0, 1, :, i, :][:, None, :]
        wr_i = w_ref[0, 0, i][None, :, :]         # (1, Cout, MT)
        wi_i = w_ref[0, 1, i][None, :, :]
        acc_r = acc_r + xr_i * wr_i - xi_i * wi_i
        acc_i = acc_i + xr_i * wi_i + xi_i * wr_i

    o_ref[0, 0] = acc_r
    o_ref[0, 1] = acc_i


def compl_mul2d_pallas(x_blocks, w_blocks):
    """x_blocks: (S, B, Cin, m1, m2) complex64; w_blocks: (S, Cin, Cout, m1, m2).

    Returns (S, B, Cout, m1, m2) complex64, matching
    torch.einsum('bixy,ioxy->boxy') applied per section s.
    """
    S, B, Cin, m1, m2 = x_blocks.shape
    Cout = w_blocks.shape[2]
    M = m1 * m2
    Mp = ((M + 127) // 128) * 128                     # lane-dense padding
    MT = next(t for t in (512, 384, 256, 128) if Mp % t == 0)

    def pack(z, lead_shape):
        zr = jnp.real(z).astype(jnp.float32).reshape(*lead_shape, M)
        zi = jnp.imag(z).astype(jnp.float32).reshape(*lead_shape, M)
        p = jnp.stack([zr, zi], axis=1)               # (S, 2, ..., M)
        if Mp != M:
            pad = [(0, 0)] * (p.ndim - 1) + [(0, Mp - M)]
            p = jnp.pad(p, pad)
        return p

    xp = pack(x_blocks, (S, B, Cin))                  # (S, 2, B, Cin, Mp)
    wp = pack(w_blocks, (S, Cin, Cout))               # (S, 2, Cin, Cout, Mp)

    grid = (S, Mp // MT)
    out = pl.pallas_call(
        _compl_mul_kernel,
        out_shape=jax.ShapeDtypeStruct((S, 2, B, Cout, Mp), jnp.float32),
        grid=grid,
        in_specs=[
            pl.BlockSpec((1, 2, B, Cin, MT), lambda s, m: (s, 0, 0, 0, m)),
            pl.BlockSpec((1, 2, Cin, Cout, MT), lambda s, m: (s, 0, 0, 0, m)),
        ],
        out_specs=pl.BlockSpec((1, 2, B, Cout, MT), lambda s, m: (s, 0, 0, 0, m)),
        compiler_params=pltpu.CompilerParams(
            dimension_semantics=("parallel", "parallel"),
            vmem_limit_bytes=32 * 1024 * 1024,
        ),
    )(xp, wp)

    out = out[..., :M]                                # drop lane padding
    out_c = (out[:, 0] + 1j * out[:, 1]).astype(jnp.complex64)
    return out_c.reshape(S, B, Cout, m1, m2)


def spectral_conv2d(x, weights1, weights2, modes1, modes2):
    """Forward pass of SpectralConv2d.  x: (B, Cin, H, W) float32 (NCHW)."""
    B, Cin, H, W = x.shape
    Cout = weights1.shape[1]

    x_ft = jnp.fft.rfft2(x)                           # (B, Cin, H, W//2+1) c64

    # Fuse top/bottom mode blocks into one Pallas call (leading axis of 2).
    x_blocks = jnp.stack(
        [x_ft[:, :, :modes1, :modes2], x_ft[:, :, H - modes1:, :modes2]], axis=0)
    w_blocks = jnp.stack([weights1, weights2], axis=0)

    out_blocks = compl_mul2d_pallas(x_blocks, w_blocks)   # (2, B, Cout, m1, m2)

    out_ft = jnp.zeros((B, Cout, H, W // 2 + 1), dtype=jnp.complex64)
    out_ft = out_ft.at[:, :, :modes1, :modes2].set(out_blocks[0])
    out_ft = out_ft.at[:, :, H - modes1:, :modes2].set(out_blocks[1])

    return jnp.fft.irfft2(out_ft, s=(H, W))           # (B, Cout, H, W) float32


def _reference(x, weights1, weights2, modes1, modes2):
    """Pure-JAX reference matching the PyTorch forward exactly."""
    B, Cin, H, W = x.shape
    Cout = weights1.shape[1]
    x_ft = jnp.fft.rfft2(x)
    out_ft = jnp.zeros((B, Cout, H, W // 2 + 1), dtype=jnp.complex64)
    out_ft = out_ft.at[:, :, :modes1, :modes2].set(
        jnp.einsum('bixy,ioxy->boxy', x_ft[:, :, :modes1, :modes2], weights1))
    out_ft = out_ft.at[:, :, H - modes1:, :modes2].set(
        jnp.einsum('bixy,ioxy->boxy', x_ft[:, :, H - modes1:, :modes2], weights2))
    return jnp.fft.irfft2(out_ft, s=(H, W))


if __name__ == "__main__":
    B, Cin, Cout, H, W = 2, 4, 4, 16, 16
    modes1, modes2 = 4, 4
    scale = 1.0 / (Cin * Cout)

    key = jax.random.PRNGKey(0)
    k1, k2, k3 = jax.random.split(key, 3)

    def init_weight(k):
        kr, ki = jax.random.split(k)
        real = jax.random.uniform(kr, (Cin, Cout, modes1, modes2), dtype=jnp.float32)
        imag = jax.random.uniform(ki, (Cin, Cout, modes1, modes2), dtype=jnp.float32)
        return (scale * (real + 1j * imag)).astype(jnp.complex64)

    weights1 = init_weight(k1)
    weights2 = init_weight(k2)
    x = jax.random.normal(k3, (B, Cin, H, W), dtype=jnp.float32)

    y = spectral_conv2d(x, weights1, weights2, modes1, modes2)
    y = jax.block_until_ready(y)

    y_ref = jax.block_until_ready(_reference(x, weights1, weights2, modes1, modes2))
    assert y.shape == (B, Cout, H, W) and y.dtype == jnp.float32
    assert np.allclose(np.asarray(y), np.asarray(y_ref), atol=1e-4, rtol=1e-4), \
        "mismatch vs reference"

    print("KERNEL_OK")
</pallas_src>

<mosaic_0001>
module attributes {stable_mosaic.version = 11 : i64} {
  func.func @_compl_mul_kernel(%arg0: i32, %arg1: i32, %arg2: memref<1x2x2x4x128xf32, #tpu.memory_space<vmem>>, %arg3: memref<1x2x4x4x128xf32, #tpu.memory_space<vmem>>, %arg4: memref<1x2x2x4x128xf32, #tpu.memory_space<vmem>>) attributes {dimension_semantics = [#tpu.dimension_semantics<parallel>, #tpu.dimension_semantics<parallel>], iteration_bounds = array<i64: 2, 1>, scalar_prefetch = 0 : i64, scratch_operands = 0 : i64, tpu.core_type = #tpu.core_type<tc>, window_params = [{transform_indices = @transform_0, window_bounds = array<i64: 1, 2, 2, 4, 128>}, {transform_indices = @transform_1, window_bounds = array<i64: 1, 2, 4, 4, 128>}, {transform_indices = @transform_2, window_bounds = array<i64: 1, 2, 2, 4, 128>}]} {
    %cst = arith.constant 0.000000e+00 : f32
    %0 = vector.broadcast %cst : f32 to vector<2x4x128xf32>
    %cst_0 = arith.constant 0.000000e+00 : f32
    %1 = vector.broadcast %cst_0 : f32 to vector<2x4x128xf32>
    %c0 = arith.constant 0 : index
    %c0_1 = arith.constant 0 : index
    %c0_2 = arith.constant 0 : index
    %c0_3 = arith.constant 0 : index
    %c0_4 = arith.constant 0 : index
    %2 = vector.load %arg2[%c0, %c0_1, %c0_2, %c0_3, %c0_4] : memref<1x2x2x4x128xf32, #tpu.memory_space<vmem>>, vector<1x1x2x1x128xf32>
    %3 = vector.shape_cast %2 : vector<1x1x2x1x128xf32> to vector<2x128xf32>
    %4 = vector.shape_cast %3 : vector<2x128xf32> to vector<2x1x128xf32>
    %c0_5 = arith.constant 0 : index
    %c1 = arith.constant 1 : index
    %c0_6 = arith.constant 0 : index
    %c0_7 = arith.constant 0 : index
    %c0_8 = arith.constant 0 : index
    %5 = vector.load %arg2[%c0_5, %c1, %c0_6, %c0_7, %c0_8] : memref<1x2x2x4x128xf32, #tpu.memory_space<vmem>>, vector<1x1x2x1x128xf32>
    %6 = vector.shape_cast %5 : vector<1x1x2x1x128xf32> to vector<2x128xf32>
    %7 = vector.shape_cast %6 : vector<2x128xf32> to vector<2x1x128xf32>
    %c0_9 = arith.constant 0 : index
    %c0_10 = arith.constant 0 : index
    %c0_11 = arith.constant 0 : index
    %c0_12 = arith.constant 0 : index
    %c0_13 = arith.constant 0 : index
    %8 = vector.load %arg3[%c0_9, %c0_10, %c0_11, %c0_12, %c0_13] : memref<1x2x4x4x128xf32, #tpu.memory_space<vmem>>, vector<1x1x1x4x128xf32>
    %9 = vector.shape_cast %8 : vector<1x1x1x4x128xf32> to vector<4x128xf32>
    %10 = vector.shape_cast %9 : vector<4x128xf32> to vector<1x4x128xf32>
    %c0_14 = arith.constant 0 : index
    %c1_15 = arith.constant 1 : index
    %c0_16 = arith.constant 0 : index
    %c0_17 = arith.constant 0 : index
    %c0_18 = arith.constant 0 : index
    %11 = vector.load %arg3[%c0_14, %c1_15, %c0_16, %c0_17, %c0_18] : memref<1x2x4x4x128xf32, #tpu.memory_space<vmem>>, vector<1x1x1x4x128xf32>
    %12 = vector.shape_cast %11 : vector<1x1x1x4x128xf32> to vector<4x128xf32>
    %13 = vector.shape_cast %12 : vector<4x128xf32> to vector<1x4x128xf32>
    %14 = vector.broadcast %4 : vector<2x1x128xf32> to vector<2x4x128xf32>
    %15 = vector.broadcast %10 : vector<1x4x128xf32> to vector<2x4x128xf32>
    %16 = arith.mulf %14, %15 : vector<2x4x128xf32>
    %17 = arith.addf %0, %16 : vector<2x4x128xf32>
    %18 = vector.broadcast %7 : vector<2x1x128xf32> to vector<2x4x128xf32>
    %19 = vector.broadcast %13 : vector<1x4x128xf32> to vector<2x4x128xf32>
    %20 = arith.mulf %18, %19 : vector<2x4x128xf32>
    %21 = arith.subf %17, %20 : vector<2x4x128xf32>
    %22 = vector.broadcast %4 : vector<2x1x128xf32> to vector<2x4x128xf32>
    %23 = vector.broadcast %13 : vector<1x4x128xf32> to vector<2x4x128xf32>
    %24 = arith.mulf %22, %23 : vector<2x4x128xf32>
    %25 = arith.addf %1, %24 : vector<2x4x128xf32>
    %26 = vector.broadcast %7 : vector<2x1x128xf32> to vector<2x4x128xf32>
    %27 = vector.broadcast %10 : vector<1x4x128xf32> to vector<2x4x128xf32>
    %28 = arith.mulf %26, %27 : vector<2x4x128xf32>
    %29 = arith.addf %25, %28 : vector<2x4x128xf32>
    %c0_19 = arith.constant 0 : index
    %c0_20 = arith.constant 0 : index
    %c0_21 = arith.constant 0 : index
    %c1_22 = arith.constant 1 : index
    %c0_23 = arith.constant 0 : index
    %30 = vector.load %arg2[%c0_19, %c0_20, %c0_21, %c1_22, %c0_23] : memref<1x2x2x4x128xf32, #tpu.memory_space<vmem>>, vector<1x1x2x1x128xf32>
    %31 = vector.shape_cast %30 : vector<1x1x2x1x128xf32> to vector<2x128xf32>
    %32 = vector.shape_cast %31 : vector<2x128xf32> to vector<2x1x128xf32>
    %c0_24 = arith.constant 0 : index
    %c1_25 = arith.constant 1 : index
    %c0_26 = arith.constant 0 : index
    %c1_27 = arith.constant 1 : index
    %c0_28 = arith.constant 0 : index
    %33 = vector.load %arg2[%c0_24, %c1_25, %c0_26, %c1_27, %c0_28] : memref<1x2x2x4x128xf32, #tpu.memory_space<vmem>>, vector<1x1x2x1x128xf32>
    %34 = vector.shape_cast %33 : vector<1x1x2x1x128xf32> to vector<2x128xf32>
    %35 = vector.shape_cast %34 : vector<2x128xf32> to vector<2x1x128xf32>
    %c0_29 = arith.constant 0 : index
    %c0_30 = arith.constant 0 : index
    %c1_31 = arith.constant 1 : index
    %c0_32 = arith.constant 0 : index
    %c0_33 = arith.constant 0 : index
    %36 = vector.load %arg3[%c0_29, %c0_30, %c1_31, %c0_32, %c0_33] : memref<1x2x4x4x128xf32, #tpu.memory_space<vmem>>, vector<1x1x1x4x128xf32>
    %37 = vector.shape_cast %36 : vector<1x1x1x4x128xf32> to vector<4x128xf32>
    %38 = vector.shape_cast %37 : vector<4x128xf32> to vector<1x4x128xf32>
    %c0_34 = arith.constant 0 : index
    %c1_35 = arith.constant 1 : index
    %c1_36 = arith.constant 1 : index
    %c0_37 = arith.constant 0 : index
    %c0_38 = arith.constant 0 : index
    %39 = vector.load %arg3[%c0_34, %c1_35, %c1_36, %c0_37, %c0_38] : memref<1x2x4x4x128xf32, #tpu.memory_space<vmem>>, vector<1x1x1x4x128xf32>
    %40 = vector.shape_cast %39 : vector<1x1x1x4x128xf32> to vector<4x128xf32>
    %41 = vector.shape_cast %40 : vector<4x128xf32> to vector<1x4x128xf32>
    %42 = vector.broadcast %32 : vector<2x1x128xf32> to vector<2x4x128xf32>
    %43 = vector.broadcast %38 : vector<1x4x128xf32> to vector<2x4x128xf32>
    %44 = arith.mulf %42, %43 : vector<2x4x128xf32>
    %45 = arith.addf %21, %44 : vector<2x4x128xf32>
    %46 = vector.broadcast %35 : vector<2x1x128xf32> to vector<2x4x128xf32>
    %47 = vector.broadcast %41 : vector<1x4x128xf32> to vector<2x4x128xf32>
    %48 = arith.mulf %46, %47 : vector<2x4x128xf32>
    %49 = arith.subf %45, %48 : vector<2x4x128xf32>
    %50 = vector.broadcast %32 : vector<2x1x128xf32> to vector<2x4x128xf32>
    %51 = vector.broadcast %41 : vector<1x4x128xf32> to vector<2x4x128xf32>
    %52 = arith.mulf %50, %51 : vector<2x4x128xf32>
    %53 = arith.addf %29, %52 : vector<2x4x128xf32>
    %54 = vector.broadcast %35 : vector<2x1x128xf32> to vector<2x4x128xf32>
    %55 = vector.broadcast %38 : vector<1x4x128xf32> to vector<2x4x128xf32>
    %56 = arith.mulf %54, %55 : vector<2x4x128xf32>
    %57 = arith.addf %53, %56 : vector<2x4x128xf32>
    %c0_39 = arith.constant 0 : index
    %c0_40 = arith.constant 0 : index
    %c0_41 = arith.constant 0 : index
    %c2 = arith.constant 2 : index
    %c0_42 = arith.constant 0 : index
    %58 = vector.load %arg2[%c0_39, %c0_40, %c0_41, %c2, %c0_42] : memref<1x2x2x4x128xf32, #tpu.memory_space<vmem>>, vector<1x1x2x1x128xf32>
    %59 = vector.shape_cast %58 : vector<1x1x2x1x128xf32> to vector<2x128xf32>
    %60 = vector.shape_cast %59 : vector<2x128xf32> to vector<2x1x128xf32>
    %c0_43 = arith.constant 0 : index
    %c1_44 = arith.constant 1 : index
    %c0_45 = arith.constant 0 : index
    %c2_46 = arith.constant 2 : index
    %c0_47 = arith.constant 0 : index
    %61 = vector.load %arg2[%c0_43, %c1_44, %c0_45, %c2_46, %c0_47] : memref<1x2x2x4x128xf32, #tpu.memory_space<vmem>>, vector<1x1x2x1x128xf32>
    %62 = vector.shape_cast %61 : vector<1x1x2x1x128xf32> to vector<2x128xf32>
    %63 = vector.shape_cast %62 : vector<2x128xf32> to vector<2x1x128xf32>
    %c0_48 = arith.constant 0 : index
    %c0_49 = arith.constant 0 : index
    %c2_50 = arith.constant 2 : index
    %c0_51 = arith.constant 0 : index
    %c0_52 = arith.constant 0 : index
    %64 = vector.load %arg3[%c0_48, %c0_49, %c2_50, %c0_51, %c0_52] : memref<1x2x4x4x128xf32, #tpu.memory_space<vmem>>, vector<1x1x1x4x128xf32>
    %65 = vector.shape_cast %64 : vector<1x1x1x4x128xf32> to vector<4x128xf32>
    %66 = vector.shape_cast %65 : vector<4x128xf32> to vector<1x4x128xf32>
    %c0_53 = arith.constant 0 : index
    %c1_54 = arith.constant 1 : index
    %c2_55 = arith.constant 2 : index
    %c0_56 = arith.constant 0 : index
    %c0_57 = arith.constant 0 : index
    %67 = vector.load %arg3[%c0_53, %c1_54, %c2_55, %c0_56, %c0_57] : memref<1x2x4x4x128xf32, #tpu.memory_space<vmem>>, vector<1x1x1x4x128xf32>
    %68 = vector.shape_cast %67 : vector<1x1x1x4x128xf32> to vector<4x128xf32>
    %69 = vector.shape_cast %68 : vector<4x128xf32> to vector<1x4x128xf32>
    %70 = vector.broadcast %60 : vector<2x1x128xf32> to vector<2x4x128xf32>
    %71 = vector.broadcast %66 : vector<1x4x128xf32> to vector<2x4x128xf32>
    %72 = arith.mulf %70, %71 : vector<2x4x128xf32>
    %73 = arith.addf %49, %72 : vector<2x4x128xf32>
    %74 = vector.broadcast %63 : vector<2x1x128xf32> to vector<2x4x128xf32>
    %75 = vector.broadcast %69 : vector<1x4x128xf32> to vector<2x4x128xf32>
    %76 = arith.mulf %74, %75 : vector<2x4x128xf32>
    %77 = arith.subf %73, %76 : vector<2x4x128xf32>
    %78 = vector.broadcast %60 : vector<2x1x128xf32> to vector<2x4x128xf32>
    %79 = vector.broadcast %69 : vector<1x4x128xf32> to vector<2x4x128xf32>
    %80 = arith.mulf %78, %79 : vector<2x4x128xf32>
    %81 = arith.addf %57, %80 : vector<2x4x128xf32>
    %82 = vector.broadcast %63 : vector<2x1x128xf32> to vector<2x4x128xf32>
    %83 = vector.broadcast %66 : vector<1x4x128xf32> to vector<2x4x128xf32>
    %84 = arith.mulf %82, %83 : vector<2x4x128xf32>
    %85 = arith.addf %81, %84 : vector<2x4x128xf32>
    %c0_58 = arith.constant 0 : index
    %c0_59 = arith.constant 0 : index
    %c0_60 = arith.constant 0 : index
    %c3 = arith.constant 3 : index
    %c0_61 = arith.constant 0 : index
    %86 = vector.load %arg2[%c0_58, %c0_59, %c0_60, %c3, %c0_61] : memref<1x2x2x4x128xf32, #tpu.memory_space<vmem>>, vector<1x1x2x1x128xf32>
    %87 = vector.shape_cast %86 : vector<1x1x2x1x128xf32> to vector<2x128xf32>
    %88 = vector.shape_cast %87 : vector<2x128xf32> to vector<2x1x128xf32>
    %c0_62 = arith.constant 0 : index
    %c1_63 = arith.constant 1 : index
    %c0_64 = arith.constant 0 : index
    %c3_65 = arith.constant 3 : index
    %c0_66 = arith.constant 0 : index
    %89 = vector.load %arg2[%c0_62, %c1_63, %c0_64, %c3_65, %c0_66] : memref<1x2x2x4x128xf32, #tpu.memory_space<vmem>>, vector<1x1x2x1x128xf32>
    %90 = vector.shape_cast %89 : vector<1x1x2x1x128xf32> to vector<2x128xf32>
    %91 = vector.shape_cast %90 : vector<2x128xf32> to vector<2x1x128xf32>
    %c0_67 = arith.constant 0 : index
    %c0_68 = arith.constant 0 : index
    %c3_69 = arith.constant 3 : index
    %c0_70 = arith.constant 0 : index
    %c0_71 = arith.constant 0 : index
    %92 = vector.load %arg3[%c0_67, %c0_68, %c3_69, %c0_70, %c0_71] : memref<1x2x4x4x128xf32, #tpu.memory_space<vmem>>, vector<1x1x1x4x128xf32>
    %93 = vector.shape_cast %92 : vector<1x1x1x4x128xf32> to vector<4x128xf32>
    %94 = vector.shape_cast %93 : vector<4x128xf32> to vector<1x4x128xf32>
    %c0_72 = arith.constant 0 : index
    %c1_73 = arith.constant 1 : index
    %c3_74 = arith.constant 3 : index
    %c0_75 = arith.constant 0 : index
    %c0_76 = arith.constant 0 : index
    %95 = vector.load %arg3[%c0_72, %c1_73, %c3_74, %c0_75, %c0_76] : memref<1x2x4x4x128xf32, #tpu.memory_space<vmem>>, vector<1x1x1x4x128xf32>
    %96 = vector.shape_cast %95 : vector<1x1x1x4x128xf32> to vector<4x128xf32>
    %97 = vector.shape_cast %96 : vector<4x128xf32> to vector<1x4x128xf32>
    %98 = vector.broadcast %88 : vector<2x1x128xf32> to vector<2x4x128xf32>
    %99 = vector.broadcast %94 : vector<1x4x128xf32> to vector<2x4x128xf32>
    %100 = arith.mulf %98, %99 : vector<2x4x128xf32>
    %101 = arith.addf %77, %100 : vector<2x4x128xf32>
    %102 = vector.broadcast %91 : vector<2x1x128xf32> to vector<2x4x128xf32>
    %103 = vector.broadcast %97 : vector<1x4x128xf32> to vector<2x4x128xf32>
    %104 = arith.mulf %102, %103 : vector<2x4x128xf32>
    %105 = arith.subf %101, %104 : vector<2x4x128xf32>
    %106 = vector.broadcast %88 : vector<2x1x128xf32> to vector<2x4x128xf32>
    %107 = vector.broadcast %97 : vector<1x4x128xf32> to vector<2x4x128xf32>
    %108 = arith.mulf %106, %107 : vector<2x4x128xf32>
    %109 = arith.addf %85, %108 : vector<2x4x128xf32>
    %110 = vector.broadcast %91 : vector<2x1x128xf32> to vector<2x4x128xf32>
    %111 = vector.broadcast %94 : vector<1x4x128xf32> to vector<2x4x128xf32>
    %112 = arith.mulf %110, %111 : vector<2x4x128xf32>
    %113 = arith.addf %109, %112 : vector<2x4x128xf32>
    %c0_77 = arith.constant 0 : index
    %c0_78 = arith.constant 0 : index
    %c0_79 = arith.constant 0 : index
    %c0_80 = arith.constant 0 : index
    %c0_81 = arith.constant 0 : index
    %114 = vector.load %arg4[%c0_77, %c0_78, %c0_79, %c0_80, %c0_81] : memref<1x2x2x4x128xf32, #tpu.memory_space<vmem>>, vector<1x1x2x4x128xf32>
    %115 = vector.shape_cast %114 : vector<1x1x2x4x128xf32> to vector<2x4x128xf32>
    %116 = vector.shape_cast %105 : vector<2x4x128xf32> to vector<1x1x2x4x128xf32>
    tpu.vector_store %arg4[%c0_77, %c0_78, %c0_79, %c0_80, %c0_81], %116 {strides = array<i32>} : memref<1x2x2x4x128xf32, #tpu.memory_space<vmem>>, vector<1x1x2x4x128xf32>,
    %c0_82 = arith.constant 0 : index
    %c1_83 = arith.constant 1 : index
    %c0_84 = arith.constant 0 : index
    %c0_85 = arith.constant 0 : index
    %c0_86 = arith.constant 0 : index
    %117 = vector.load %arg4[%c0_82, %c1_83, %c0_84, %c0_85, %c0_86] : memref<1x2x2x4x128xf32, #tpu.memory_space<vmem>>, vector<1x1x2x4x128xf32>
    %118 = vector.shape_cast %117 : vector<1x1x2x4x128xf32> to vector<2x4x128xf32>
    %119 = vector.shape_cast %113 : vector<2x4x128xf32> to vector<1x1x2x4x128xf32>
    tpu.vector_store %arg4[%c0_82, %c1_83, %c0_84, %c0_85, %c0_86], %119 {strides = array<i32>} : memref<1x2x2x4x128xf32, #tpu.memory_space<vmem>>, vector<1x1x2x4x128xf32>,
    return
  }
  func.func @transform_0(%arg0: i32, %arg1: i32) -> (i32, i32, i32, i32, i32) {
    %c0_i32 = arith.constant 0 : i32
    %c0_i32_0 = arith.constant 0 : i32
    %c0_i32_1 = arith.constant 0 : i32
    %c0_i32_2 = arith.constant 0 : i32
    return %arg0, %c0_i32, %c0_i32_0, %c0_i32_1, %arg1 : i32, i32, i32, i32, i32
  }
  func.func @transform_1(%arg0: i32, %arg1: i32) -> (i32, i32, i32, i32, i32) {
    %c0_i32 = arith.constant 0 : i32
    %c0_i32_0 = arith.constant 0 : i32
    %c0_i32_1 = arith.constant 0 : i32
    %c0_i32_2 = arith.constant 0 : i32
    return %arg0, %c0_i32, %c0_i32_0, %c0_i32_1, %arg1 : i32, i32, i32, i32, i32
  }
  func.func @transform_2(%arg0: i32, %arg1: i32) -> (i32, i32, i32, i32, i32) {
    %c0_i32 = arith.constant 0 : i32
    %c0_i32_0 = arith.constant 0 : i32
    %c0_i32_1 = arith.constant 0 : i32
    %c0_i32_2 = arith.constant 0 : i32
    return %arg0, %c0_i32, %c0_i32_0, %c0_i32_1, %arg1 : i32, i32, i32, i32, i32
  }
}

</mosaic_0001>

<bundles_post_ra>
// kernel: tpu_custom_call.1
= control target key start
LH: loop header
LB: loop body
LE: loop exit
PB: predicated region body
PF: predicated region fallthrough
CT: control target
= control target key end

     0   :  { %7 = vsyncpa [#allocation3], 0  ;;  %s1077_s0 = inlined_call_operand.hbm [shape: f32[2,2,2,4,128], index: 0, kind: input, shape index: {}]   ;;  %s1078_s1 = inlined_call_operand.hbm [shape: f32[2,2,4,4,128], index: 1, kind: input, shape index: {}]   ;;  %s1079_s2 = inlined_call_operand.hbm [shape: f32[2,2,2,4,128], index: 2, kind: output, shape index: {}]  }
   0x1   :  { %9 = vsyncpa [#allocation3 + $0x1], 0 }
   0x2   :  { %10 = vsyncpa [#allocation6], 0 }
   0x3   :  { %12 = vsyncpa [#allocation6 + $0x1], 0 }
   0x4   :  { %13 = vsyncpa [#allocation4], 0 }
   0x5   :  { %15 = vsyncpa [#allocation4 + $0x1], 0  ;;  %s808_s9 = smov 0   ;;  %s810_s10 = smov 0  }
   0x6   :  { %s812_s11 = smov 0   ;;  %s814_s12 = smov 0  }
   0x7   :  { %s816_s13 = smov 0   ;;  %s818_s14 = smov 0  }
   0x8 LB: > { %s512_s15 = sadd.s32 4294967295, %s784_s14   ;;  %s513_s16 = sadd.s32 4294967294, %s784_s14   ;;  %s784_s14 = sphi %s818_s14, %s21_s14   ;;  %s780_s13 = sphi %s816_s13, %s1097_s13   ;;  %s776_s12 = sphi %s814_s12, %s1096_s12   ;;  %s772_s11 = sphi %s812_s11, %s1095_s11   ;;  %s768_s10 = sphi %s810_s10, %s1094_s10   ;;  %s764_s9 = sphi %s808_s9, %s1093_s9  }
   0x9   : > { %s33_s17 = sadd.s32 1, %s780_s13  ;;  %s42_s18 = sadd.s32 1, %s772_s11 }
   0xa   : > { %p35_p0 = scmp.ge.s32.totalorder %s33_s17, 2  ;;  %p49_p1 = scmp.ne.s32.totalorder %s772_s11, %s768_s10 }
   0xb   : > { %p50_p2 = scmp.eq.s32.totalorder %s784_s14, 0  ;;  %p55_p3 = scmp.ne.s32.totalorder %s768_s10, %s764_s9 }
   0xc   : > { %s1099_s17 = smov (%p35_p0, %s33_s17), 0  ;;  %p56_p5 = scmp.eq.s32.totalorder %s512_s15, 0 }
   0xd   : > { %p849_p4 = por %p50_p2, %p49_p1  ;;  %s37_s20 = ssub.s32 %s780_s13, %s1099_s17 }
   0xe   : > { %p109_p6 = scmp.eq.s32.totalorder %s512_s15, 1  ;;  %p40_p7 = scmp.eq.s32.totalorder %s37_s20, 0 }
   0xf   : > { %p855_p8 = por %p56_p5, %p55_p3  ;;  %p115_p10 = scmp.eq.s32.totalorder %s513_s16, 1 }
  0x10   : > { %p859_p9 = por %p109_p6, %p49_p1  ;;  %p584_p13 = scmp.lt.s32.totalorder %s784_s14, 2 }
  0x11   : > { %s1083_s21 = scalar_select %p855_p8, 1, 0 }
  0x12   : > { %s1084_s22 = scalar_select %p859_p9, 1, 0 }
  0x13   : > { %s864_s23 = scalar_select %p40_p7, %s772_s11, %s42_s18  }
  0x14   : > { %p866_p11 = por %p115_p10, %p55_p3  ;;  %s873_s25 = sand.u32 1, %s772_s11  }
  0x15   : > { %s516_s26 = sshll.u32 %s873_s25, 4  ;;  %s564_s27 = sshll.u32 %s780_s13, 8 }
  0x16   : > { %s1085_s24 = scalar_select %p866_p11, 1, 0 }
  0x17   : > { %s880_s30 = scalar_lea.hbm %s1077_s0, %s564_s27  ;;  %s139_s3 = scalar_lea.vmem [#allocation2], %s516_s26 }
  0x18   : > { %s147_s4 = sshll.u32 %s139_s3, 4  ;;  %p886_p0 = pnand %p584_p13, %p849_p4  ;;  %s882_s4 = int_to_ptr.vmem [resolvable:$true] %s147_s4 }
  0x19   : > { %s136_s6 = scalar_lea.sflag [#allocation3], %s873_s25  ;;  %s638_s7 = scalar_lea.hbm %s880_s30, 256 }
  0x1a   : > { %p639_p2 = scmp.ne.s32.totalorder %s880_s30, %s638_s7  ;;  %p640_p3 = pneg %p886_p0 }
  0x1b   : > { %s643_s16 = scalar_lea.hbm %s1077_s0, 512  ;;  %p644_p4 = scmp.lt.u32.totalorder %s880_s30, %s1077_s0 }
  0x1c   : > { %p641_p5 = pnand %p640_p3, %p639_p2  ;;  %p645_p7 = scmp.lt.u32.totalorder %s643_s16, %s638_s7 }
  0x1d   : > { %p647_p13 = scmp.lt.u32.totalorder %s638_s7, %s880_s30 }
  0x1e   : > { %p642_p6 = pneg %p641_p5  ;;  %p646_p10 = por %p645_p7, %p644_p4 }
  0x20   : > { %p648_p12 = por %p647_p13, %p646_p10 }
  0x22   : > { %p649_p1 = pnand %p648_p12, %p642_p6 }
  0x24   : > { %652 = shalt.err (!%p649_p1)
}
  0x25   : > { %s653_s20 = scalar_lea.vmem %s882_s4, 256  ;;  %s786_s26 = smov [#allocation2]  }
  0x26   : > { %p654_p2 = scmp.ne.s32.totalorder %s882_s4, %s653_s20  ;;  %s658_s27 = sshll.u32 %s786_s26, 4  ;;  %s659_s27 = int_to_ptr.vmem [resolvable:$false] %s658_s27 }
  0x27   : > { %s660_s28 = scalar_lea.vmem %s659_s27, 512  ;;  %p661_p9 = scmp.lt.s32.totalorder %s882_s4, %s659_s27 }
  0x28   : > { %p656_p5 = pnand %p654_p2, %p640_p3  ;;  %p662_p4 = scmp.lt.s32.totalorder %s660_s28, %s653_s20 }
  0x2a   : > { %p657_p11 = pneg %p656_p5  ;;  %p663_p7 = por %p662_p4, %p661_p9 }
  0x2c   : > { %p664_p10 = pnand %p663_p7, %p657_p11 }
  0x2e   : > { %667 = shalt.err (!%p664_p10)
}
  0x2f   : > { %s787_s29 = smov 64   ;;  %s788_s3 = smov 4  }
  0x30   : > { %576 = dma.hbm_to_vmem [thread:$0]  (!%p886_p0), %s880_s30, 256, %s882_s4, %s136_s6, %s787_s29, %s787_s29, %s788_s3  }
  0x31   : > { %p177_p9 = scmp.lt.s32.totalorder %s784_s14, 3  ;;  %s519_s7 = sshll.u32 %s873_s25, 5 }
  0x32   : > { %s565_s8 = sshll.u32 %s780_s13, 9  ;;  %p1087_p11 = scmp.ge.s32.totalorder %s784_s14, 1 }
  0x33   : > { %s934_s19 = scalar_lea.hbm %s1078_s1, %s565_s8  ;;  %s161_s20 = scalar_lea.vmem [#allocation5], %s519_s7 }
  0x34   : > { %p927_p12 = pnand %p1087_p11, %p177_p9  ;;  %s169_s26 = sshll.u32 %s161_s20, 4  ;;  %s936_s26 = int_to_ptr.vmem [resolvable:$true] %s169_s26 }
  0x35   : > { %s158_s30 = scalar_lea.sflag [#allocation6], %s873_s25  ;;  %s668_s4 = scalar_lea.hbm %s934_s19, 512 }
  0x36   : > { %p669_p1 = scmp.ne.s32.totalorder %s934_s19, %s668_s4  ;;  %s673_s28 = scalar_lea.hbm %s1078_s1, 1024 }
  0x37   : > { %p674_p2 = scmp.lt.u32.totalorder %s934_s19, %s1078_s1  ;;  %p675_p5 = scmp.lt.u32.totalorder %s673_s28, %s668_s4 }
  0x38   : > { %p671_p6 = pnand %p669_p1, %p640_p3  ;;  %p677_p7 = scmp.lt.u32.totalorder %s668_s4, %s934_s19 }
  0x39   : > { %p676_p4 = por %p675_p5, %p674_p2 }
  0x3a   : > { %p672_p13 = pneg %p671_p6 }
  0x3b   : > { %p678_p10 = por %p677_p7, %p676_p4 }
  0x3d   : > { %p679_p9 = pnand %p678_p10, %p672_p13 }
  0x3f   : > { %682 = shalt.err (!%p679_p9)
}
  0x40   : > { %s683_s7 = scalar_lea.vmem %s936_s26, 512  ;;  %s789_s18 = smov [#allocation5]  }
  0x41   : > { %p684_p11 = scmp.ne.s32.totalorder %s936_s26, %s683_s7  ;;  %s688_s20 = sshll.u32 %s789_s18, 4  ;;  %s689_s20 = int_to_ptr.vmem [resolvable:$false] %s688_s20 }
  0x42   : > { %s690_s6 = scalar_lea.vmem %s689_s20, 1024  ;;  %p691_p8 = scmp.lt.s32.totalorder %s936_s26, %s689_s20 }
  0x43   : > { %p686_p1 = pnand %p684_p11, %p640_p3  ;;  %p692_p2 = scmp.lt.s32.totalorder %s690_s6, %s683_s7 }
  0x45   : > { %p687_p6 = pneg %p686_p1  ;;  %p693_p5 = por %p692_p2, %p691_p8 }
  0x47   : > { %p694_p4 = pnand %p693_p5, %p687_p6 }
  0x49   : > { %697 = shalt.err (!%p694_p4)
}
  0x4a   : > { %579 = dma.hbm_to_vmem [thread:$0]  (!%p886_p0), %s934_s19, 512, %s936_s26, %s158_s30, %s787_s29, %s787_s29, %s788_s3  }
  0x4b   : > { %181 = sbr.rel (%p927_p12) target bundleno = 125 (0x7d), region = 28  ;;  %s970_s4 = sand.u32 (!%p927_p12), 1, %s768_s10  }
  0x4c   : > { %s523_s27 = sshll.u32 (!%p927_p12), %s970_s4, 4  ;;  %s184_s5 = scalar_lea.sflag (!%p927_p12), [#allocation3], %s970_s4 }
  0x4d   : > { %s976_s28 = scalar_lea.vmem (!%p927_p12), [#allocation2], %s523_s27  ;;  %p1089_p8 = scmp.ne.s32.totalorder (!%p927_p12), %s1083_s21, 0 }
  0x52   : > { %751 = dma.done.wait (%p1089_p8), %s184_s5, 256  }
  0x53   : > { %753 = vsyncadd (%p1089_p8), %s184_s5, 4294967040  ;;  %s524_s25 = sshll.u32 %s970_s4, 5  ;;  %s193_s29 = scalar_lea.sflag [#allocation6], %s970_s4 }
  0x54   : > { %s984_s3 = scalar_lea.vmem [#allocation5], %s524_s25 }
  0x55   : > { %755 = dma.done.wait (%p1089_p8), %s193_s29, 512  }
  0x56   : > { %757 = vsyncadd (%p1089_p8), %s193_s29, 4294966784  ;;  %v529_v0 = vld [vmem:[%s976_s28] ss:$0 sm:$0xff]  ;;  %v531_v1 = vld [vmem:[%s976_s28 + $0x8] ss:$0 sm:$0xff]  ;;  %s221_s21 = scalar_lea.vmem [#allocation7], %s523_s27 }
  0x57   : > { %v227_v2 = vld [vmem:[%s984_s3] sm:$0xf]  ;;  %v528_v3 = vld [vmem:[%s984_s3 + $0x10] sm:$0xf]  ;;  %v539_v6 = vld [vmem:[%s976_s28 + $0x9] ss:$0 sm:$0xff] }
  0x58   : > { %v238_v4 = vmul.f32 %v529_v0, %v227_v2  ;;  %v537_v5 = vld [vmem:[%s976_s28 + $0x1] ss:$0 sm:$0xff]  ;;  %v258_v7 = vmul.f32 %v531_v1, %v227_v2  ;;  %v250_v8 = vmul.f32 %v531_v1, %v528_v3  ;;  %v535_v9 = vld [vmem:[%s984_s3 + $0x4] sm:$0xf]  ;;  %v536_v10 = vld [vmem:[%s984_s3 + $0x14] sm:$0xf]  ;;  %v254_v11 = vmul.f32 %v529_v0, %v528_v3 }
  0x59   : > { %v278_v12 = vmul.f32 %v537_v5, %v535_v9  ;;  %v545_v13 = vld [vmem:[%s976_s28 + $0x2] ss:$0 sm:$0xff]  ;;  %v543_v14 = vld [vmem:[%s984_s3 + $0x8] sm:$0xf]  ;;  %v294_v15 = vmul.f32 %v537_v5, %v536_v10  ;;  %v290_v17 = vmul.f32 %v539_v6, %v536_v10  ;;  %v544_v19 = vld [vmem:[%s984_s3 + $0x18] sm:$0xf]  ;;  %v298_v25 = vmul.f32 %v539_v6, %v535_v9 }
  0x5a   : > { %v252_v16 = vsub.f32 %v238_v4, %v250_v8  ;;  %v547_v18 = vld [vmem:[%s976_s28 + $0xa] ss:$0 sm:$0xff]  ;;  %v553_v20 = vld [vmem:[%s976_s28 + $0x3] ss:$0 sm:$0xff]  ;;  %v260_v21 = vadd.f32 %v258_v7, %v254_v11  ;;  %v1004_v22 = vld [vmem:[%s984_s3 + $0xc] sm:$0xf]  ;;  %v318_v27 = vmul.f32 %v545_v13, %v543_v14  ;;  %v334_v36 = vmul.f32 %v545_v13, %v544_v19 }
  0x5b   : > { %v530_v23 = vld [vmem:[%s976_s28 + $0x4] ss:$0 sm:$0xff]  ;;  %v532_v24 = vld [vmem:[%s976_s28 + $0xc] ss:$0 sm:$0xff]  ;;  %v538_v30 = vld [vmem:[%s976_s28 + $0x5] ss:$0 sm:$0xff]  ;;  %v330_v33 = vmul.f32 %v547_v18, %v544_v19  ;;  %v358_v40 = vmul.f32 %v553_v20, %v1004_v22  ;;  %v338_v46 = vmul.f32 %v547_v18, %v543_v14 }
  0x5c   : > { %v280_v26 = vadd.f32 %v278_v12, %v252_v16  ;;  %v239_v28 = vmul.f32 %v530_v23, %v227_v2  ;;  %v251_v29 = vmul.f32 %v532_v24, %v528_v3  ;;  %v540_v31 = vld [vmem:[%s976_s28 + $0xd] ss:$0 sm:$0xff]  ;;  %v546_v32 = vld [vmem:[%s976_s28 + $0x6] ss:$0 sm:$0xff]  ;;  %v279_v34 = vmul.f32 %v538_v30, %v535_v9  ;;  %v555_v38 = vld [vmem:[%s976_s28 + $0xb] ss:$0 sm:$0xff] }
  0x5d   : > { %v296_v35 = vadd.f32 %v294_v15, %v260_v21  ;;  %v552_v39 = vld [vmem:[%s984_s3 + $0x1c] sm:$0xf]  ;;  %v291_v42 = vmul.f32 %v540_v31, %v536_v10  ;;  %v319_v44 = vmul.f32 %v546_v32, %v543_v14  ;;  %v255_v47 = vmul.f32 %v530_v23, %v528_v3  ;;  %v554_v50 = vld [vmem:[%s976_s28 + $0x7] ss:$0 sm:$0xff]  ;;  %s402_s15 = sshll.u32 %s221_s21, 4  ;;  %s566_s19 = sshll.u32 %s776_s12, 8  ;;  %s1023_s15 = int_to_ptr.vmem [resolvable:$true] %s402_s15 }
  0x5e   : > { %v292_v37 = vsub.f32 %v280_v26, %v290_v17  ;;  %v253_v41 = vsub.f32 %v239_v28, %v251_v29  ;;  %v548_v43 = vld [vmem:[%s976_s28 + $0xe] ss:$0 sm:$0xff]  ;;  %v259_v51 = vmul.f32 %v532_v24, %v227_v2  ;;  %v295_v52 = vmul.f32 %v538_v30, %v536_v10  ;;  %v556_v59 = vld [vmem:[%s976_s28 + $0xf] ss:$0 sm:$0xff]  ;;  %s1028_s8 = scalar_lea.hbm %s1079_s2, %s566_s19  ;;  %s388_s16 = scalar_lea.sflag [#allocation4], %s970_s4 }
  0x5f   : > { %v300_v45 = vadd.f32 %v298_v25, %v296_v35  ;;  %v370_v53 = vmul.f32 %v555_v38, %v552_v39  ;;  %v331_v54 = vmul.f32 %v548_v43, %v544_v19  ;;  %v374_v56 = vmul.f32 %v553_v20, %v552_v39  ;;  %s698_s7 = scalar_lea.vmem %s1023_s15, 256  ;;  %p1090_p3 = scmp.ne.s32.totalorder %s1084_s22, 0 }
  0x60   : > { %v320_v48 = vadd.f32 %v318_v27, %v292_v37  ;;  %v281_v49 = vadd.f32 %v279_v34, %v253_v41  ;;  %v261_v60 = vadd.f32 %v259_v51, %v255_v47  ;;  %v299_v61 = vmul.f32 %v540_v31, %v535_v9  ;;  %p699_p0 = scmp.ne.s32.totalorder %s1023_s15, %s698_s7  ;;  %s790_s12 = smov [#allocation7]  }
  0x61   : > { %v336_v55 = vadd.f32 %v334_v36, %v300_v45  ;;  %v359_v62 = vmul.f32 %v554_v50, %v1004_v22  ;;  %v378_v0 = vmul.f32 %v555_v38, %v1004_v22  ;;  %v335_v2 = vmul.f32 %v546_v32, %v544_v19  ;;  %s702_s18 = sshll.u32 %s790_s12, 4  ;;  %s703_s18 = int_to_ptr.vmem [resolvable:$false] %s702_s18 }
  0x62   : > { %v332_v57 = vsub.f32 %v320_v48, %v330_v33  ;;  %v293_v58 = vsub.f32 %v281_v49, %v291_v42  ;;  %v297_v4 = vadd.f32 %v295_v52, %v261_v60  ;;  %v371_v5 = vmul.f32 %v556_v59, %v552_v39  ;;  %p700_p12 = pnand %p699_p0, %p1090_p3  ;;  %s704_s20 = scalar_lea.vmem %s703_s18, 512 }
  0x63   : > { %v340_v63 = vadd.f32 %v338_v46, %v336_v55  ;;  %v339_v11 = vmul.f32 %v548_v43, %v543_v14  ;;  %v375_v15 = vmul.f32 %v554_v50, %v552_v39  ;;  %v379_v18 = vmul.f32 %v556_v59, %v1004_v22  ;;  %p705_p7 = scmp.lt.s32.totalorder %s1023_s15, %s703_s18  ;;  %p706_p10 = scmp.lt.s32.totalorder %s704_s20, %s698_s7 }
  0x64   : > { %v360_v1 = vadd.f32 %v358_v40, %v332_v57  ;;  %v321_v3 = vadd.f32 %v319_v44, %v293_v58  ;;  %v301_v10 = vadd.f32 %v299_v61, %v297_v4  ;;  %p701_p13 = pneg %p700_p12 }
  0x65   : > { %v376_v6 = vadd.f32 %v374_v56, %v340_v63  ;;  %p707_p9 = por %p706_p10, %p705_p7 }
  0x66   : > { %v372_v7 = vsub.f32 %v360_v1, %v370_v53  ;;  %v333_v8 = vsub.f32 %v321_v3, %v331_v54  ;;  %v337_v13 = vadd.f32 %v335_v2, %v301_v10 }
  0x67   : > { %v380_v12 = vadd.f32 %v378_v0, %v376_v6  ;;  %p708_p11 = pnand %p707_p9, %p701_p13 }
  0x68   : > { %382 = vst [vmem:[%s221_s21] sm:$0xf] %v372_v7  ;;  %v361_v9 = vadd.f32 %v359_v62, %v333_v8  ;;  %v341_v17 = vadd.f32 %v339_v11, %v337_v13 }
  0x69   : > { %557 = vst [vmem:[%s221_s21 + $0x8] sm:$0xf] %v380_v12 }
  0x6a   : > { %v373_v16 = vsub.f32 %v361_v9, %v371_v5  ;;  %v377_v19 = vadd.f32 %v375_v15, %v341_v17 }
  0x6c   : > { %383 = vst [vmem:[%s221_s21 + $0x4] sm:$0xf] %v373_v16  ;;  %v381_v14 = vadd.f32 %v379_v18, %v377_v19 }
  0x6e   : > { %558 = vst [vmem:[%s221_s21 + $0xc] sm:$0xf] %v381_v14 }
  0x6f   : > { %711 = shalt.err (!%p708_p11)
}
  0x70   : > { %s712_s6 = scalar_lea.hbm %s1028_s8, 256  ;;  %s716_s28 = scalar_lea.hbm %s1079_s2, 512 }
  0x71   : > { %p713_p1 = scmp.ne.s32.totalorder %s1028_s8, %s712_s6  ;;  %p717_p5 = scmp.lt.u32.totalorder %s1028_s8, %s1079_s2 }
  0x72   : > { %p718_p4 = scmp.lt.u32.totalorder %s716_s28, %s712_s6  ;;  %p720_p0 = scmp.lt.u32.totalorder %s712_s6, %s1028_s8 }
  0x73   : > { %p714_p6 = pnand %p713_p1, %p1090_p3 }
  0x74   : > { %p719_p8 = por %p718_p4, %p717_p5 }
  0x75   : > { %p715_p2 = pneg %p714_p6 }
  0x76   : > { %p721_p12 = por %p720_p0, %p719_p8 }
  0x78   : > { %p722_p13 = pnand %p721_p12, %p715_p2 }
  0x7a   : > { %725 = shalt.err (!%p722_p13)
}
  0x7b   : > { %s791_s3 = smov 64   ;;  %s792_s21 = smov 4  }
  0x7c   : > { %571 = dma.vmem_to_hbm [thread:$0]  (%p1090_p3), %s1023_s15, 256, %s1028_s8, %s388_s16, %s791_s3, %s791_s3, %s792_s21  }
  0x7d PF: > { %s417_s19 = sand.u32 1, %s764_s9   ;;  %p1091_p7 = scmp.ne.s32.totalorder %s1085_s24, 0 }
  0x7e   : > { %p1092_p10 = scmp.ge.s32.totalorder %s784_s14, 2  ;;  %s418_s26 = scalar_lea.sflag [#allocation4], %s417_s19 }
  0x80   : > { %p581_p9 = pnand %p1092_p10, %p1091_p7 }
  0x82   : > { %759 = dma.done.wait (!%p581_p9), %s418_s26, 256  }
  0x83   : > { %761 = vsyncadd (!%p581_p9), %s418_s26, 4294967040  ;;  %s21_s14 = sadd.s32 1, %s784_s14   ;;  %s1093_s9 = smov %s768_s10 }
  0x84   : > { %p18_p11 = scmp.ge.s32.totalorder %s21_s14, 4   ;;  %s1094_s10 = smov %s772_s11 }
  0x85   : > { %s1095_s11 = smov %s864_s23  ;;  %s1096_s12 = smov %s780_s13 }
  0x86   : > { %s1097_s13 = smov %s1099_s17  ;;  %20 = sbr.rel (!%p18_p11) target bundleno = 8 (0x8), region = 95 }
  0x8d   :  { %423 = vsyncpa [#allocation3], 1 }
  0x8e   :  { %425 = vsyncpa [#allocation3 + $0x1], 1 }
  0x8f   :  { %426 = vsyncpa [#allocation6], 1 }
  0x90   :  { %428 = vsyncpa [#allocation6 + $0x1], 1 }
  0x91   :  { %429 = vsyncpa [#allocation4], 1 }
  0x92   :  { %431 = vsyncpa [#allocation4 + $0x1], 1 }

</bundles_post_ra>
